<compile_context>
chip_gen: v7x
topology: tpu7x:2x2x1
jax: 0.10.0
libtpu: 0.0.40
codegen_flags: <defaults>
</compile_context>

<pallas_src>
import functools
import math

import numpy as np
import jax
import jax.numpy as jnp
from jax import lax
from jax.experimental import pallas as pl
from jax.experimental.pallas import tpu as pltpu


# ----------------------------------------------------------------------------
# Host-side constants
# ----------------------------------------------------------------------------
def _bilinear_matrix(n_in, n_out):
    """Interpolation matrix [n_out, n_in] for bilinear, align_corners=True."""
    M = np.zeros((n_out, n_in), dtype=np.float64)
    if n_in == 1 or n_out == 1:
        M[:, 0] = 1.0
        return M
    scale = (n_in - 1) / (n_out - 1)
    for i in range(n_out):
        s = i * scale
        h0 = min(int(np.floor(s)), n_in - 1)
        h1 = min(h0 + 1, n_in - 1)
        f = s - h0
        M[i, h0] += 1.0 - f
        M[i, h1] += f
    return M


def _conv_band_matrices(w_hwio, width):
    """Per-dy banded weight matrices for a 3x3 'SAME' conv on a channel-folded row.

    w_hwio: [3, 3, Cin, Cout]
    returns float64 array [3, width*Cin, width*Cout] such that
        out_row = sum_dy  x_row[h+dy-1]  @  bands[dy]
    with horizontal zero-padding baked in (out-of-range taps omitted).
    """
    kh, kw, cin, cout = w_hwio.shape
    w_np = np.asarray(w_hwio, dtype=np.float64)
    bands = np.zeros((kh, width * cin, width * cout), dtype=np.float64)
    for dy in range(kh):
        for col in range(width):
            for dx in range(kw):
                src = col + dx - (kw // 2)
                if 0 <= src < width:
                    bands[dy, src * cin:(src + 1) * cin,
                          col * cout:(col + 1) * cout] = w_np[dy, dx]
    return bands


def _fold_bn(gamma, beta, mean, var, eps=1e-5):
    scale = gamma / jnp.sqrt(var + eps)
    shift = beta - mean * scale
    return scale.reshape(1, -1), shift.reshape(1, -1)


# ----------------------------------------------------------------------------
# Fused kernel: conv1+bn1+relu+residual + bilinear x2 upsample + conv2+bn2+relu
# ----------------------------------------------------------------------------
def _upsample_head_kernel(x_ref, bands1_ref, scale1_ref, shift1_ref, uh_ref,
                          bands2_ref, scale2_ref, shift2_ref, out_ref,
                          *, Nb, H, WC, H2, WO):
    x = x_ref[...]                                                # [Nb, H, WC]
    zrow = jnp.zeros((Nb, 1, WC), jnp.float32)
    xpad = jnp.concatenate([zrow, x, zrow], axis=1)               # [Nb, H+2, WC]

    # ---- conv1: three lane-dense banded matmuls (dy = -1, 0, +1) ----
    y = None
    for dy in range(3):
        xs = xpad[:, dy:dy + H, :].reshape(Nb * H, WC)
        t = jnp.dot(xs, bands1_ref[dy], preferred_element_type=jnp.float32)
        y = t if y is None else y + t                             # [Nb*H, WC]

    # bn1 + relu + residual, all in the folded lane-dense layout
    y = jnp.maximum(y * scale1_ref[...] + shift1_ref[...], 0.0)
    y = y + x.reshape(Nb * H, WC)
    y = y.reshape(Nb, H, WC)

    # ---- bilinear x2 height upsample (align_corners=True): small MXU matmul ----
    uh = uh_ref[...]                                              # [H2, H]
    ups = [jnp.dot(uh, y[n], preferred_element_type=jnp.float32) for n in range(Nb)]
    a = ups[0][None] if Nb == 1 else jnp.stack(ups, axis=0)       # [Nb, H2, WC]

    # ---- width upsample is folded into the conv2 band matrices (host-side),
    #      so conv2 is again three banded matmuls on the NARROW activation ----
    apad = jnp.concatenate([zrow, a, zrow], axis=1)               # [Nb, H2+2, WC]
    z = None
    for dy in range(3):
        asl = apad[:, dy:dy + H2, :].reshape(Nb * H2, WC)
        t = jnp.dot(asl, bands2_ref[dy], preferred_element_type=jnp.float32)
        z = t if z is None else z + t                             # [Nb*H2, WO]

    z = jnp.maximum(z * scale2_ref[...] + shift2_ref[...], 0.0)
    out_ref[...] = z.reshape(Nb, H2, WO)                          # lane-dense store


# ----------------------------------------------------------------------------
# Wrapper
# ----------------------------------------------------------------------------
def upsample_head_forward(x_nchw, params, *, images_per_step=None):
    """Forward pass matching UpsampleHead.forward (stride=1, BN in eval mode)."""
    x = jnp.transpose(x_nchw, (0, 2, 3, 1))                       # NCHW -> NHWC
    N, H, W, C = x.shape
    H2, W2 = 2 * H, 2 * W
    Cout = params["w2"].shape[-1]
    WC = W * C
    WO = W2 * Cout

    # Batch images per grid step; keep >= 2 grid steps when possible so both
    # v7x TensorCores get work (no-op on single-TC v5e/v6e).
    if images_per_step is None:
        images_per_step = max(1, N // 2)
    Nb = max(1, math.gcd(int(images_per_step), N))
    G = N // Nb

    # --- host-side constants (float64 build, float32 on device) ---
    bands1 = jnp.asarray(
        _conv_band_matrices(np.asarray(params["w1"]), W).astype(np.float32))
    uw = _bilinear_matrix(W, W2)                                  # [W2, W]
    uw_fold = np.kron(uw.T, np.eye(C))                            # [W*C, W2*C]
    bands2_wide = _conv_band_matrices(np.asarray(params["w2"]), W2)
    bands2 = jnp.asarray(
        np.einsum("kw,dwo->dko", uw_fold, bands2_wide).astype(np.float32))
    uh = jnp.asarray(_bilinear_matrix(H, H2).astype(np.float32))  # [H2, H]

    # lane-dense (tiled) BN scale/shift vectors
    s1 = jnp.tile(params["bn1_scale"].reshape(1, C), (1, W))      # [1, WC]
    b1 = jnp.tile(params["bn1_shift"].reshape(1, C), (1, W))
    s2 = jnp.tile(params["bn2_scale"].reshape(1, Cout), (1, W2))  # [1, WO]
    b2 = jnp.tile(params["bn2_shift"].reshape(1, Cout), (1, W2))

    xf = x.reshape(N, H, WC)                                      # channel-folded

    flops = int(N * (2 * H * WC * WC * 3 + 2 * H2 * H * WC + 2 * H2 * WC * WO * 3))
    bytes_accessed = int(4 * (N * H * WC + N * H2 * WO
                              + 3 * WC * WC + 3 * WC * WO
                              + H2 * H + 2 * WC + 2 * WO))

    kernel = functools.partial(_upsample_head_kernel,
                               Nb=Nb, H=H, WC=WC, H2=H2, WO=WO)
    out_f = pl.pallas_call(
        kernel,
        out_shape=jax.ShapeDtypeStruct((N, H2, WO), jnp.float32),
        grid=(G,),
        in_specs=[
            pl.BlockSpec((Nb, H, WC), lambda g: (g, 0, 0)),       # x (folded)
            pl.BlockSpec((3, WC, WC), lambda g: (0, 0, 0)),       # conv1 bands
            pl.BlockSpec((1, WC), lambda g: (0, 0)),              # bn1 scale (tiled)
            pl.BlockSpec((1, WC), lambda g: (0, 0)),              # bn1 shift (tiled)
            pl.BlockSpec((H2, H), lambda g: (0, 0)),              # height interp
            pl.BlockSpec((3, WC, WO), lambda g: (0, 0, 0)),       # conv2 bands (width-up folded)
            pl.BlockSpec((1, WO), lambda g: (0, 0)),              # bn2 scale (tiled)
            pl.BlockSpec((1, WO), lambda g: (0, 0)),              # bn2 shift (tiled)
        ],
        out_specs=pl.BlockSpec((Nb, H2, WO), lambda g: (g, 0, 0)),
        compiler_params=pltpu.CompilerParams(
            dimension_semantics=("parallel",),                    # batches independent
            vmem_limit_bytes=32 * 1024 * 1024),
        cost_estimate=pl.CostEstimate(flops=flops, transcendentals=0,
                                      bytes_accessed=bytes_accessed),
    )(xf, bands1, s1, b1, uh, bands2, s2, b2)

    out = out_f.reshape(N, H2, W2, Cout)
    return jnp.transpose(out, (0, 3, 1, 2))                       # NHWC -> NCHW


# ----------------------------------------------------------------------------
# Pure-JAX reference (same math, no Pallas) for a sanity check
# ----------------------------------------------------------------------------
def _reference(x_nchw, params):
    x = jnp.transpose(x_nchw, (0, 2, 3, 1))
    N, H, W, C = x.shape
    dn1 = lax.conv_dimension_numbers(x.shape, params["w1"].shape,
                                     ("NHWC", "HWIO", "NHWC"))
    out = lax.conv_general_dilated(x, params["w1"], (1, 1), "SAME",
                                   dimension_numbers=dn1)
    out = out * params["bn1_scale"][0] + params["bn1_shift"][0]
    out = jnp.maximum(out, 0.0) + x
    uh = jnp.asarray(_bilinear_matrix(H, 2 * H).astype(np.float32))
    uw = jnp.asarray(_bilinear_matrix(W, 2 * W).astype(np.float32))
    out = jnp.einsum("ih,nhwc->niwc", uh, out)
    out = jnp.einsum("jw,niwc->nijc", uw, out)
    dn2 = lax.conv_dimension_numbers(out.shape, params["w2"].shape,
                                     ("NHWC", "HWIO", "NHWC"))
    out = lax.conv_general_dilated(out, params["w2"], (1, 1), "SAME",
                                   dimension_numbers=dn2)
    out = out * params["bn2_scale"][0] + params["bn2_shift"][0]
    out = jnp.maximum(out, 0.0)
    return jnp.transpose(out, (0, 3, 1, 2))


# ----------------------------------------------------------------------------
if __name__ == "__main__":
    N, inplanes, planes, H, W = 2, 4, 8, 16, 16

    key = jax.random.PRNGKey(0)
    ks = jax.random.split(key, 10)

    x = jax.random.normal(ks[0], (N, inplanes, H, W), dtype=jnp.float32)

    # conv weights in HWIO (kernel_h, kernel_w, in, out)
    w1 = 0.1 * jax.random.normal(ks[1], (3, 3, inplanes, inplanes), jnp.float32)
    w2 = 0.1 * jax.random.normal(ks[2], (3, 3, inplanes, planes), jnp.float32)

    # deterministic BatchNorm (inference) parameters
    g1 = 1.0 + 0.1 * jax.random.normal(ks[3], (inplanes,), jnp.float32)
    be1 = 0.05 * jax.random.normal(ks[4], (inplanes,), jnp.float32)
    m1 = 0.1 * jax.random.normal(ks[5], (inplanes,), jnp.float32)
    v1 = 0.5 + jax.random.uniform(ks[6], (inplanes,), jnp.float32)
    g2 = 1.0 + 0.1 * jax.random.normal(ks[7], (planes,), jnp.float32)
    be2 = 0.05 * jax.random.normal(ks[8], (planes,), jnp.float32)
    m2 = 0.1 * jax.random.normal(ks[9], (planes,), jnp.float32)
    v2 = jnp.linspace(0.6, 1.4, planes, dtype=jnp.float32)

    s1, b1 = _fold_bn(g1, be1, m1, v1)
    s2, b2 = _fold_bn(g2, be2, m2, v2)

    params = dict(w1=w1, w2=w2, bn1_scale=s1, bn1_shift=b1,
                  bn2_scale=s2, bn2_shift=b2)

    out = upsample_head_forward(x, params)
    out = jax.block_until_ready(out)

    ref = jax.block_until_ready(_reference(x, params))
    assert out.shape == (N, planes, 2 * H, 2 * W), out.shape
    np.testing.assert_allclose(np.asarray(out), np.asarray(ref),
                               rtol=1e-4, atol=1e-4)

    print("KERNEL_OK")
</pallas_src>

<mosaic_0001>
module attributes {stable_mosaic.version = 11 : i64} {
  func.func @_upsample_head_kernel(%arg0: i32, %arg1: memref<1x16x64xf32, #tpu.memory_space<vmem>>, %arg2: memref<3x64x64xf32, #tpu.memory_space<vmem>>, %arg3: memref<1x64xf32, #tpu.memory_space<vmem>>, %arg4: memref<1x64xf32, #tpu.memory_space<vmem>>, %arg5: memref<32x16xf32, #tpu.memory_space<vmem>>, %arg6: memref<3x64x256xf32, #tpu.memory_space<vmem>>, %arg7: memref<1x256xf32, #tpu.memory_space<vmem>>, %arg8: memref<1x256xf32, #tpu.memory_space<vmem>>, %arg9: memref<1x32x256xf32, #tpu.memory_space<vmem>>) attributes {dimension_semantics = [#tpu.dimension_semantics<parallel>], iteration_bounds = array<i64: 2>, scalar_prefetch = 0 : i64, scratch_operands = 0 : i64, tpu.core_type = #tpu.core_type<tc>, window_params = [{transform_indices = @transform_0, window_bounds = array<i64: 1, 16, 64>}, {pipeline_mode = #tpu.pipeline_mode<synchronous>, transform_indices = @transform_1, window_bounds = array<i64: 3, 64, 64>}, {pipeline_mode = #tpu.pipeline_mode<synchronous>, transform_indices = @transform_2, window_bounds = array<i64: 1, 64>}, {pipeline_mode = #tpu.pipeline_mode<synchronous>, transform_indices = @transform_3, window_bounds = array<i64: 1, 64>}, {pipeline_mode = #tpu.pipeline_mode<synchronous>, transform_indices = @transform_4, window_bounds = array<i64: 32, 16>}, {pipeline_mode = #tpu.pipeline_mode<synchronous>, transform_indices = @transform_5, window_bounds = array<i64: 3, 64, 256>}, {pipeline_mode = #tpu.pipeline_mode<synchronous>, transform_indices = @transform_6, window_bounds = array<i64: 1, 256>}, {pipeline_mode = #tpu.pipeline_mode<synchronous>, transform_indices = @transform_7, window_bounds = array<i64: 1, 256>}, {transform_indices = @transform_8, window_bounds = array<i64: 1, 32, 256>}]} {
    %c0 = arith.constant 0 : index
    %c0_0 = arith.constant 0 : index
    %c0_1 = arith.constant 0 : index
    %0 = vector.load %arg1[%c0, %c0_0, %c0_1] : memref<1x16x64xf32, #tpu.memory_space<vmem>>, vector<1x16x64xf32>
    %cst = arith.constant 0.000000e+00 : f32
    %1 = vector.broadcast %cst : f32 to vector<1x1x64xf32>
    %2 = tpu.concatenate %1, %0, %1 in 1 : vector<1x1x64xf32>, vector<1x16x64xf32>, vector<1x1x64xf32> -> vector<1x18x64xf32>
    %3 = vector.extract_strided_slice %2 {offsets = [0, 0, 0], sizes = [1, 16, 64], strides = [1, 1, 1]} : vector<1x18x64xf32> to vector<1x16x64xf32>
    %4 = vector.shape_cast %3 : vector<1x16x64xf32> to vector<16x64xf32>
    %c0_2 = arith.constant 0 : index
    %c0_3 = arith.constant 0 : index
    %c0_4 = arith.constant 0 : index
    %5 = vector.load %arg2[%c0_2, %c0_3, %c0_4] : memref<3x64x64xf32, #tpu.memory_space<vmem>>, vector<1x64x64xf32>
    %6 = vector.shape_cast %5 : vector<1x64x64xf32> to vector<64x64xf32>
    %cst_5 = arith.constant dense<0.000000e+00> : vector<16x64xf32>
    %7 = tpu.matmul %4, %6, %cst_5 {dimension_numbers = #tpu.dot_dimension_numbers<[1], [0], [0], [1], [0, 0, 1, 1], [], []>} : vector<16x64xf32>, vector<64x64xf32>, vector<16x64xf32> -> vector<16x64xf32>
    %8 = vector.extract_strided_slice %2 {offsets = [0, 1, 0], sizes = [1, 16, 64], strides = [1, 1, 1]} : vector<1x18x64xf32> to vector<1x16x64xf32>
    %9 = vector.shape_cast %8 : vector<1x16x64xf32> to vector<16x64xf32>
    %c1 = arith.constant 1 : index
    %c0_6 = arith.constant 0 : index
    %c0_7 = arith.constant 0 : index
    %10 = vector.load %arg2[%c1, %c0_6, %c0_7] : memref<3x64x64xf32, #tpu.memory_space<vmem>>, vector<1x64x64xf32>
    %11 = vector.shape_cast %10 : vector<1x64x64xf32> to vector<64x64xf32>
    %cst_8 = arith.constant dense<0.000000e+00> : vector<16x64xf32>
    %12 = tpu.matmul %9, %11, %cst_8 {dimension_numbers = #tpu.dot_dimension_numbers<[1], [0], [0], [1], [0, 0, 1, 1], [], []>} : vector<16x64xf32>, vector<64x64xf32>, vector<16x64xf32> -> vector<16x64xf32>
    %13 = arith.addf %7, %12 : vector<16x64xf32>
    %14 = vector.extract_strided_slice %2 {offsets = [0, 2, 0], sizes = [1, 16, 64], strides = [1, 1, 1]} : vector<1x18x64xf32> to vector<1x16x64xf32>
    %15 = vector.shape_cast %14 : vector<1x16x64xf32> to vector<16x64xf32>
    %c2 = arith.constant 2 : index
    %c0_9 = arith.constant 0 : index
    %c0_10 = arith.constant 0 : index
    %16 = vector.load %arg2[%c2, %c0_9, %c0_10] : memref<3x64x64xf32, #tpu.memory_space<vmem>>, vector<1x64x64xf32>
    %17 = vector.shape_cast %16 : vector<1x64x64xf32> to vector<64x64xf32>
    %cst_11 = arith.constant dense<0.000000e+00> : vector<16x64xf32>
    %18 = tpu.matmul %15, %17, %cst_11 {dimension_numbers = #tpu.dot_dimension_numbers<[1], [0], [0], [1], [0, 0, 1, 1], [], []>} : vector<16x64xf32>, vector<64x64xf32>, vector<16x64xf32> -> vector<16x64xf32>
    %19 = arith.addf %13, %18 : vector<16x64xf32>
    %c0_12 = arith.constant 0 : index
    %c0_13 = arith.constant 0 : index
    %20 = vector.load %arg3[%c0_12, %c0_13] : memref<1x64xf32, #tpu.memory_space<vmem>>, vector<1x64xf32>
    %21 = vector.broadcast %20 : vector<1x64xf32> to vector<16x64xf32>
    %22 = arith.mulf %19, %21 : vector<16x64xf32>
    %c0_14 = arith.constant 0 : index
    %c0_15 = arith.constant 0 : index
    %23 = vector.load %arg4[%c0_14, %c0_15] : memref<1x64xf32, #tpu.memory_space<vmem>>, vector<1x64xf32>
    %24 = vector.broadcast %23 : vector<1x64xf32> to vector<16x64xf32>
    %25 = arith.addf %22, %24 : vector<16x64xf32>
    %cst_16 = arith.constant 0.000000e+00 : f32
    %26 = vector.broadcast %cst_16 : f32 to vector<16x64xf32>
    %27 = arith.maximumf %25, %26 : vector<16x64xf32>
    %28 = vector.shape_cast %0 : vector<1x16x64xf32> to vector<16x64xf32>
    %29 = arith.addf %27, %28 : vector<16x64xf32>
    %30 = vector.shape_cast %29 : vector<16x64xf32> to vector<1x16x64xf32>
    %c0_17 = arith.constant 0 : index
    %c0_18 = arith.constant 0 : index
    %31 = vector.load %arg5[%c0_17, %c0_18] : memref<32x16xf32, #tpu.memory_space<vmem>>, vector<32x16xf32>
    %32 = vector.shape_cast %30 : vector<1x16x64xf32> to vector<16x64xf32>
    %cst_19 = arith.constant dense<0.000000e+00> : vector<32x64xf32>
    %33 = tpu.matmul %31, %32, %cst_19 {dimension_numbers = #tpu.dot_dimension_numbers<[1], [0], [0], [1], [0, 0, 1, 1], [], []>} : vector<32x16xf32>, vector<16x64xf32>, vector<32x64xf32> -> vector<32x64xf32>
    %34 = vector.shape_cast %33 : vector<32x64xf32> to vector<1x32x64xf32>
    %35 = tpu.concatenate %1, %34, %1 in 1 : vector<1x1x64xf32>, vector<1x32x64xf32>, vector<1x1x64xf32> -> vector<1x34x64xf32>
    %36 = vector.extract_strided_slice %35 {offsets = [0, 0, 0], sizes = [1, 32, 64], strides = [1, 1, 1]} : vector<1x34x64xf32> to vector<1x32x64xf32>
    %37 = vector.shape_cast %36 : vector<1x32x64xf32> to vector<32x64xf32>
    %c0_20 = arith.constant 0 : index
    %c0_21 = arith.constant 0 : index
    %c0_22 = arith.constant 0 : index
    %38 = vector.load %arg6[%c0_20, %c0_21, %c0_22] : memref<3x64x256xf32, #tpu.memory_space<vmem>>, vector<1x64x256xf32>
    %39 = vector.shape_cast %38 : vector<1x64x256xf32> to vector<64x256xf32>
    %cst_23 = arith.constant dense<0.000000e+00> : vector<32x256xf32>
    %40 = tpu.matmul %37, %39, %cst_23 {dimension_numbers = #tpu.dot_dimension_numbers<[1], [0], [0], [1], [0, 0, 1, 1], [], []>} : vector<32x64xf32>, vector<64x256xf32>, vector<32x256xf32> -> vector<32x256xf32>
    %41 = vector.extract_strided_slice %35 {offsets = [0, 1, 0], sizes = [1, 32, 64], strides = [1, 1, 1]} : vector<1x34x64xf32> to vector<1x32x64xf32>
    %42 = vector.shape_cast %41 : vector<1x32x64xf32> to vector<32x64xf32>
    %c1_24 = arith.constant 1 : index
    %c0_25 = arith.constant 0 : index
    %c0_26 = arith.constant 0 : index
    %43 = vector.load %arg6[%c1_24, %c0_25, %c0_26] : memref<3x64x256xf32, #tpu.memory_space<vmem>>, vector<1x64x256xf32>
    %44 = vector.shape_cast %43 : vector<1x64x256xf32> to vector<64x256xf32>
    %cst_27 = arith.constant dense<0.000000e+00> : vector<32x256xf32>
    %45 = tpu.matmul %42, %44, %cst_27 {dimension_numbers = #tpu.dot_dimension_numbers<[1], [0], [0], [1], [0, 0, 1, 1], [], []>} : vector<32x64xf32>, vector<64x256xf32>, vector<32x256xf32> -> vector<32x256xf32>
    %46 = arith.addf %40, %45 : vector<32x256xf32>
    %47 = vector.extract_strided_slice %35 {offsets = [0, 2, 0], sizes = [1, 32, 64], strides = [1, 1, 1]} : vector<1x34x64xf32> to vector<1x32x64xf32>
    %48 = vector.shape_cast %47 : vector<1x32x64xf32> to vector<32x64xf32>
    %c2_28 = arith.constant 2 : index
    %c0_29 = arith.constant 0 : index
    %c0_30 = arith.constant 0 : index
    %49 = vector.load %arg6[%c2_28, %c0_29, %c0_30] : memref<3x64x256xf32, #tpu.memory_space<vmem>>, vector<1x64x256xf32>
    %50 = vector.shape_cast %49 : vector<1x64x256xf32> to vector<64x256xf32>
    %cst_31 = arith.constant dense<0.000000e+00> : vector<32x256xf32>
    %51 = tpu.matmul %48, %50, %cst_31 {dimension_numbers = #tpu.dot_dimension_numbers<[1], [0], [0], [1], [0, 0, 1, 1], [], []>} : vector<32x64xf32>, vector<64x256xf32>, vector<32x256xf32> -> vector<32x256xf32>
    %52 = arith.addf %46, %51 : vector<32x256xf32>
    %c0_32 = arith.constant 0 : index
    %c0_33 = arith.constant 0 : index
    %53 = vector.load %arg7[%c0_32, %c0_33] : memref<1x256xf32, #tpu.memory_space<vmem>>, vector<1x256xf32>
    %54 = vector.broadcast %53 : vector<1x256xf32> to vector<32x256xf32>
    %55 = arith.mulf %52, %54 : vector<32x256xf32>
    %c0_34 = arith.constant 0 : index
    %c0_35 = arith.constant 0 : index
    %56 = vector.load %arg8[%c0_34, %c0_35] : memref<1x256xf32, #tpu.memory_space<vmem>>, vector<1x256xf32>
    %57 = vector.broadcast %56 : vector<1x256xf32> to vector<32x256xf32>
    %58 = arith.addf %55, %57 : vector<32x256xf32>
    %cst_36 = arith.constant 0.000000e+00 : f32
    %59 = vector.broadcast %cst_36 : f32 to vector<32x256xf32>
    %60 = arith.maximumf %58, %59 : vector<32x256xf32>
    %61 = vector.shape_cast %60 : vector<32x256xf32> to vector<1x32x256xf32>
    %c0_37 = arith.constant 0 : index
    %c0_38 = arith.constant 0 : index
    %c0_39 = arith.constant 0 : index
    %62 = vector.load %arg9[%c0_37, %c0_38, %c0_39] : memref<1x32x256xf32, #tpu.memory_space<vmem>>, vector<1x32x256xf32>
    tpu.vector_store %arg9[%c0_37, %c0_38, %c0_39], %61 {strides = array<i32>} : memref<1x32x256xf32, #tpu.memory_space<vmem>>, vector<1x32x256xf32>,
    return
  }
  func.func @transform_0(%arg0: i32) -> (i32, i32, i32) {
    %c0_i32 = arith.constant 0 : i32
    %c0_i32_0 = arith.constant 0 : i32
    %c0_i32_1 = arith.constant 0 : i32
    return %arg0, %c0_i32, %c0_i32_0 : i32, i32, i32
  }
  func.func @transform_1(%arg0: i32) -> (i32, i32, i32) {
    %c0_i32 = arith.constant 0 : i32
    %c0_i32_0 = arith.constant 0 : i32
    %c0_i32_1 = arith.constant 0 : i32
    %c0_i32_2 = arith.constant 0 : i32
    return %c0_i32, %c0_i32_0, %c0_i32_1 : i32, i32, i32
  }
  func.func @transform_2(%arg0: i32) -> (i32, i32) {
    %c0_i32 = arith.constant 0 : i32
    %c0_i32_0 = arith.constant 0 : i32
    %c0_i32_1 = arith.constant 0 : i32
    return %c0_i32, %c0_i32_0 : i32, i32
  }
  func.func @transform_3(%arg0: i32) -> (i32, i32) {
    %c0_i32 = arith.constant 0 : i32
    %c0_i32_0 = arith.constant 0 : i32
    %c0_i32_1 = arith.constant 0 : i32
    return %c0_i32, %c0_i32_0 : i32, i32
  }
  func.func @transform_4(%arg0: i32) -> (i32, i32) {
    %c0_i32 = arith.constant 0 : i32
    %c0_i32_0 = arith.constant 0 : i32
    %c0_i32_1 = arith.constant 0 : i32
    return %c0_i32, %c0_i32_0 : i32, i32
  }
  func.func @transform_5(%arg0: i32) -> (i32, i32, i32) {
    %c0_i32 = arith.constant 0 : i32
    %c0_i32_0 = arith.constant 0 : i32
    %c0_i32_1 = arith.constant 0 : i32
    %c0_i32_2 = arith.constant 0 : i32
    return %c0_i32, %c0_i32_0, %c0_i32_1 : i32, i32, i32
  }
  func.func @transform_6(%arg0: i32) -> (i32, i32) {
    %c0_i32 = arith.constant 0 : i32
    %c0_i32_0 = arith.constant 0 : i32
    %c0_i32_1 = arith.constant 0 : i32
    return %c0_i32, %c0_i32_0 : i32, i32
  }
  func.func @transform_7(%arg0: i32) -> (i32, i32) {
    %c0_i32 = arith.constant 0 : i32
    %c0_i32_0 = arith.constant 0 : i32
    %c0_i32_1 = arith.constant 0 : i32
    return %c0_i32, %c0_i32_0 : i32, i32
  }
  func.func @transform_8(%arg0: i32) -> (i32, i32, i32) {
    %c0_i32 = arith.constant 0 : i32
    %c0_i32_0 = arith.constant 0 : i32
    %c0_i32_1 = arith.constant 0 : i32
    return %arg0, %c0_i32, %c0_i32_0 : i32, i32, i32
  }
}

</mosaic_0001>

<bundles_post_ra>
// kernel: tpu_custom_call.1
= control target key start
LH: loop header
LB: loop body
LE: loop exit
PB: predicated region body
PF: predicated region fallthrough
CT: control target
= control target key end

     0   :  { %13 = vsyncpa [#allocation3], 0  ;;  %s2107_s0 = inlined_call_operand.vmem [shape: f32[2,16,64], index: 0, kind: input, shape index: {}]   ;;  %s2108_s1 = inlined_call_operand.hbm [shape: f32[3,64,64], index: 1, kind: input, shape index: {}]   ;;  %s2109_s2 = inlined_call_operand.vmem [shape: f32[1,64], index: 2, kind: input, shape index: {}]   ;;  %s2110_s3 = inlined_call_operand.vmem [shape: f32[1,64], index: 3, kind: input, shape index: {}]   ;;  %s2111_s4 = inlined_call_operand.vmem [shape: f32[32,16], index: 4, kind: input, shape index: {}]   ;;  %s2112_s5 = inlined_call_operand.hbm [shape: f32[3,64,256], index: 5, kind: input, shape index: {}]   ;;  %s2113_s6 = inlined_call_operand.vmem [shape: f32[1,256], index: 6, kind: input, shape index: {}]   ;;  %s2114_s7 = inlined_call_operand.vmem [shape: f32[1,256], index: 7, kind: input, shape index: {}]   ;;  %s2115_s8 = inlined_call_operand.hbm [shape: f32[2,32,256], index: 8, kind: output, shape index: {}]  }
   0x1   :  { %14 = vsyncpa [#allocation6], 0 }
   0x2   :  { %15 = vsyncpa [#allocation4], 0 }
   0x3   :  { %17 = vsyncpa [#allocation4 + $0x1], 0  ;;  %s1803_s27 = smov 0   ;;  %s1805_s28 = smov 0  }
   0x4   :  { %s1807_s29 = smov 0   ;;  %s1809_s30 = smov 0  }
   0x5 LB: > { %2120 = sst [smem:[#allocation11_spill]] %s1742_s29  ;;  %s1824_s9 = sadd.s32 4294967295, %s1746_s30   ;;  %s1746_s30 = sphi %s1809_s30, %s2137_s30   ;;  %s1742_s29 = sphi %s1807_s29, %s2134_s29   ;;  %s1738_s28 = sphi %s1805_s28, %s2136_s28   ;;  %s1734_s27 = sphi %s1803_s27, %s2135_s27  }
   0x6   : > { %s1288_s10 = sadd.s32 4294967294, %s1746_s30   ;;  %s1828_s11 = sadd.s32 1, %s1746_s30  }
   0x7   : > { %s203_s12 = sadd.s32 1, %s1742_s29  ;;  %s200_s13 = ssub.s32 %s1746_s30, %s1828_s11 }
   0x8   : > { %p213_p0 = scmp.ne.s32.totalorder %s1742_s29, %s1738_s28  ;;  %p201_p1 = scmp.eq.s32.totalorder %s200_s13, 0 }
   0x9   : > { %p214_p2 = scmp.eq.s32.totalorder %s1824_s9, 1  ;;  %p219_p3 = scmp.ne.s32.totalorder %s1738_s28, %s1734_s27 }
   0xa   : > { %p220_p4 = scmp.eq.s32.totalorder %s1288_s10, 1  ;;  %p1289_p7 = scmp.ge.s32.totalorder %s1746_s30, 1 }
   0xb   : > { %s1839_s14 = scalar_select %p201_p1, %s1742_s29, %s203_s12  }
   0xc   : > { %p1841_p5 = por %p214_p2, %p213_p0  ;;  %p1845_p6 = por %p220_p4, %p219_p3 }
   0xd   : > { %2121 = sst [smem:[#allocation12_spill]] %s1839_s14  ;;  %p227_p8 = scmp.lt.s32.totalorder %s1746_s30, 3 }
   0xe   : > { %s2122_s15 = scalar_select %p1841_p5, 1, 0 }
   0xf   : > { %s2123_s16 = scalar_select %p1845_p6, 1, 0 }
  0x10   : > { %p2116_p9 = scmp.eq.s32.totalorder %s1824_s9, 0  ;;  %p1852_p10 = pnand %p1289_p7, %p227_p8 }
  0x11   : > { %s1748_s18 = smov [#allocation2]   ;;  %s1749_s21 = smov [#allocation5]  }
  0x12   : > { %s2124_s17 = scalar_select %p1852_p10, 1, 0 }
  0x13   : > { %s239_s19 = sshll.u32 %s1748_s18, 4  ;;  %p1563_p11 = pneg %p1852_p10  ;;  %s240_s19 = int_to_ptr.vmem [resolvable:$true] %s239_s19 }
  0x14   : > { %s261_s22 = sshll.u32 %s1749_s21, 4  ;;  %s1620_s25 = scalar_lea.hbm %s2108_s1, 3072  ;;  %s1864_s22 = int_to_ptr.vmem [resolvable:$true] %s261_s22 }
  0x15   : > { %p1860_p12 = pnand %p2116_p9, %p1563_p11  ;;  %p1621_p13 = scmp.ne.s32.totalorder %s2108_s1, %s1620_s25 }
  0x16   : > { %p1627_p3 = scmp.lt.u32.totalorder %s1620_s25, %s2108_s1 }
  0x17   : > { %p1622_p0 = pneg %p1860_p12 }
  0x19   : > { %p1623_p1 = pnand %p1622_p0, %p1621_p13 }
  0x1b   : > { %p1624_p2 = pneg %p1623_p1 }
  0x1d   : > { %p1629_p4 = pnand %p1627_p3, %p1624_p2 }
  0x1f   : > { %1632 = shalt.err (!%p1629_p4)
}
  0x20   : > { %s1633_s18 = scalar_lea.vmem %s240_s19, 3072  ;;  %p1641_p9 = scmp.lt.s32.totalorder %s240_s19, %s240_s19 }
  0x21   : > { %p1634_p7 = scmp.ne.s32.totalorder %s240_s19, %s1633_s18  ;;  %p1642_p6 = scmp.lt.s32.totalorder %s1633_s18, %s1633_s18 }
  0x23   : > { %p1636_p8 = pnand %p1634_p7, %p1622_p0  ;;  %p1643_p5 = por %p1642_p6, %p1641_p9 }
  0x25   : > { %p1637_p11 = pneg %p1636_p8 }
  0x27   : > { %p1644_p10 = pnand %p1643_p5, %p1637_p11 }
  0x29   : > { %1647 = shalt.err (!%p1644_p10)
}
  0x2a   : > { %s1750_s21 = smov 128   ;;  %s1751_s23 = smov 8  }
  0x2b   : > { %1566 = dma.hbm_to_vmem [thread:$0]  (!%p1860_p12), %s2108_s1, 3072, %s240_s19, [#allocation3], %s1750_s21, %s1750_s21, %s1751_s23  }
  0x2c   : > { %s1648_s12 = scalar_lea.hbm %s2112_s5, 6144 }
  0x2d   : > { %p1649_p13 = scmp.ne.s32.totalorder %s2112_s5, %s1648_s12  ;;  %p1655_p9 = scmp.lt.u32.totalorder %s1648_s12, %s2112_s5 }
  0x2f   : > { %p1651_p5 = pnand %p1649_p13, %p1622_p0 }
  0x31   : > { %p1652_p6 = pneg %p1651_p5 }
  0x33   : > { %p1657_p10 = pnand %p1655_p9, %p1652_p6 }
  0x35   : > { %1660 = shalt.err (!%p1657_p10)
}
  0x36   : > { %s1661_s19 = scalar_lea.vmem %s1864_s22, 6144  ;;  %p1669_p4 = scmp.lt.s32.totalorder %s1864_s22, %s1864_s22 }
  0x37   : > { %p1662_p1 = scmp.ne.s32.totalorder %s1864_s22, %s1661_s19  ;;  %p1670_p7 = scmp.lt.s32.totalorder %s1661_s19, %s1661_s19 }
  0x39   : > { %p1664_p2 = pnand %p1662_p1, %p1622_p0  ;;  %p1671_p8 = por %p1670_p7, %p1669_p4 }
  0x3b   : > { %p1665_p3 = pneg %p1664_p2 }
  0x3d   : > { %p1672_p11 = pnand %p1671_p8, %p1665_p3 }
  0x3f   : > { %1675 = shalt.err (!%p1672_p11)
}
  0x40   : > { %s1752_s29 = smov 256   ;;  %s1753_s14 = smov 16  }
  0x41   : > { %1569 = dma.hbm_to_vmem [thread:$0]  (!%p1860_p12), %s2112_s5, 6144, %s1864_s22, [#allocation6], %s1752_s29, %s1752_s29, %s1753_s14  }
  0x42   : > { %p2126_p13 = scmp.ne.s32.totalorder %s2124_s17, 0 }
  0x43   : > { %p2127_p0 = scmp.eq.s32.totalorder (!%p2126_p13), %s1824_s9, 0 }
  0x44   : > { %291 = sbr.rel (%p2126_p13) target bundleno = 854 (0x356), region = 52 }
  0x4b   : > { %1721 = dma.done.wait (%p2127_p0), [#allocation3], 3072   ;;  %p2128_p5 = pmov %p2127_p0 }
  0x4c   : > { %p2129_p6 = pmov %p2127_p0 }
  0x4d   : > { %1723 = vsyncadd (%p2128_p5), [#allocation3], 4294964224 }
  0x4e   : > { %1725 = dma.done.wait (%p2129_p6), [#allocation6], 6144   ;;  %p2130_p9 = pmov %p2127_p0 }
  0x4f   : > { %p329_p10 = scmp.lt.s32.totalorder %s1824_s9, 1  ;;  %v355_v0 = vld [vmem:[#allocation2 + $0x40] sm:$0xff]  ;;  %v356_v1 = vld [vmem:[#allocation2 + $0x48] sm:$0xff]  ;;  %v357_v2 = vld [vmem:[#allocation2 + $0x50] sm:$0xff]  ;;  %vm338_vm0 = vcmask 1040384   ;;  %vm365_vm1 = vcmask 1046528  }
  0x50   : > { %1727 = vsyncadd (%p2130_p9), [#allocation6], 4294961152  ;;  %v1433_v3 = vpack.c.bf16 %v356_v1, %v355_v0  ;;  %v358_v4 = vld [vmem:[#allocation2 + $0x58] sm:$0xff]  ;;  %v359_v6 = vld [vmem:[#allocation2 + $0x60] sm:$0xff]  ;;  %vm371_vm2 = vcmask 523264   ;;  %vm539_vm3 = vcmask 1045504  }
  0x51   : > { %s330_s20 = scalar_select %p329_p10, %s1824_s9, 1  ;;  %v1437_v5 = vpack.c.bf16 %v358_v4, %v357_v2  ;;  %v360_v7 = vld [vmem:[#allocation2 + $0x68] sm:$0xff]  ;;  %v361_v14 = vld [vmem:[#allocation2 + $0x70] sm:$0xff]  ;;  %v362_v15 = vld [vmem:[#allocation2 + $0x78] sm:$0xff]  ;;  %vm652_vm4 = vcmask 130048  }
  0x52   : > { %1434 = vmatprep.subr.bf16.mxu0 %v1433_v3  ;;  %v1441_v12 = vpack.c.bf16 %v360_v7, %v359_v6  ;;  %v1445_v19 = vpack.c.bf16 %v362_v15, %v361_v14  ;;  %v346_v22 = vld [vmem:[#allocation2] sm:$0xff]  ;;  %v347_v23 = vld [vmem:[#allocation2 + $0x8] sm:$0xff]  ;;  %v348_v26 = vld [vmem:[#allocation2 + $0x10] sm:$0xff]  ;;  %s326_s10 = sand.u32 1, %s1738_s28   ;;  %s1329_s19 = sshll.u32 %s1824_s9, 10 }
  0x53   : > { %s1328_s22 = sshll.u32 %s330_s20, 4  ;;  %1436 = vmatpush3.bf16.msra.mxu0 %v1433_v3  ;;  %v1449_v25 = vpack.c.bf16 %v347_v23, %v346_v22  ;;  %v349_v27 = vld [vmem:[#allocation2 + $0x18] sm:$0xff]  ;;  %v350_v30 = vld [vmem:[#allocation2 + $0x20] sm:$0xff]  ;;  %v351_v31 = vld [vmem:[#allocation2 + $0x28] sm:$0xff]  ;;  %s1296_s12 = sshll.u32 %s326_s10, 6 }
  0x54   : > { %s333_s25 = scalar_lea.vmem %s2107_s0, %s1328_s22  ;;  %1438 = vmatprep.subr.bf16.mxu0 %v1437_v5  ;;  %v1453_v29 = vpack.c.bf16 %v349_v27, %v348_v26  ;;  %v1457_v32 = vpack.c.bf16 %v351_v31, %v350_v30  ;;  %v352_v33 = vld [vmem:[#allocation2 + $0x30] sm:$0xff]  ;;  %v353_v34 = vld [vmem:[#allocation2 + $0x38] sm:$0xff]  ;;  %v531_v36 = vld [vmem:[#allocation2 + $0x80] sm:$0xff]  ;;  %s2045_s13 = scalar_lea.vmem [#allocation7], %s1296_s12 }
  0x55   : > { %v1928_v8 = vld [vmem:[%s333_s25] sm:$0xff]  ;;  %v1930_v9 = vld [vmem:[%s333_s25 + $0x8] sm:$0xff]  ;;  %v1461_v35 = vpack.c.bf16 %v353_v34, %v352_v33  ;;  %v533_v41 = vld [vmem:[#allocation2 + $0x90] sm:$0xff]  ;;  %v1754_v33 = vmov 0.0   ;;  %s1204_s18 = sshll.u32 %s2045_s13, 4  ;;  %s2060_s21 = scalar_lea.hbm %s2115_s8, %s1329_s19  ;;  %s2055_s18 = int_to_ptr.vmem [resolvable:$true] %s1204_s18 }
  0x56   : > { %v339_v10 = vrot.slane %v1928_v8, 7  ;;  %v340_v11 = vrot.slane %v1930_v9, 7  ;;  %v532_v37 = vld [vmem:[#allocation2 + $0x88] sm:$0xff]  ;;  %v534_v42 = vld [vmem:[#allocation2 + $0x98] sm:$0xff]  ;;  %v535_v45 = vld [vmem:[#allocation2 + $0xa0] sm:$0xff]  ;;  %881 = vmatprep.mubr.f32.mxu1 %v1754_v33  ;;  %s2066_s23 = scalar_lea.sflag [#allocation4], %s326_s10 }
  0x57   : > { %1440 = vmatpush3.bf16.msra.mxu0 %v1437_v5  ;;  %v1465_v38 = vpack.c.bf16 %v532_v37, %v531_v36  ;;  %v1469_v43 = vpack.c.bf16 %v534_v42, %v533_v41  ;;  %v536_v46 = vld [vmem:[#allocation2 + $0xa8] sm:$0xff]  ;;  %v537_v48 = vld [vmem:[#allocation2 + $0xb0] sm:$0xff]  ;;  %v538_v49 = vld [vmem:[#allocation2 + $0xb8] sm:$0xff]  ;;  %s1676_s9 = scalar_lea.vmem %s2055_s18, 1024  ;;  %p2131_p1 = scmp.ne.s32.totalorder %s2122_s15, 0 }
  0x58   : > { %v344_v13 = vsel %vm338_vm0, 0.0, %v339_v10  ;;  %v1936_v16 = vsel %vm338_vm0, %v339_v10, %v340_v11  ;;  %1442 = vmatprep.subr.bf16.mxu0 %v1441_v12  ;;  %v345_v21 = vsel %vm338_vm0, %v340_v11, 0.0  ;;  %v1473_v47 = vpack.c.bf16 %v536_v46, %v535_v45  ;;  %v648_v53 = vld [vmem:[%s2111_s4] sm:$0xff]  ;;  %v783_v54 = vld [vmem:[#allocation5 + $0x88] sm:$0xff]  ;;  %v785_v55 = vld [vmem:[#allocation5 + $0x98] sm:$0xff]  ;;  %p1677_p12 = scmp.ne.s32.totalorder %s2055_s18, %s1676_s9  ;;  %s1755_s20 = smov [#allocation7]  }
  0x59   : > { %v366_v17 = vrot.slane %v344_v13, 1  ;;  %v367_v18 = vrot.slane %v1936_v16, 1  ;;  %v369_v24 = vrot.slane %v345_v21, 1  ;;  %v540_v39 = vrot.slane %v344_v13, 2  ;;  %v782_v56 = vld [vmem:[#allocation5 + $0x80] sm:$0xff]  ;;  %v784_v58 = vld [vmem:[#allocation5 + $0x90] sm:$0xff] }
  0x5a   : > { %v541_v40 = vrot.slane %v1936_v16, 2  ;;  %v1477_v50 = vpack.c.bf16 %v538_v49, %v537_v48  ;;  %v543_v51 = vrot.slane %v345_v21, 2  ;;  %v1485_v57 = vpack.c.bf16 %v785_v55, %v783_v54  ;;  %v787_v59 = vld [vmem:[#allocation5 + $0xa8] sm:$0xff]  ;;  %v789_v60 = vld [vmem:[#allocation5 + $0xb8] sm:$0xff]  ;;  %v786_v63 = vld [vmem:[#allocation5 + $0xa0] sm:$0xff]  ;;  %p1678_p2 = pnand %p1677_p12, %p2131_p1  ;;  %s1680_s22 = sshll.u32 %s1755_s20, 4  ;;  %s1681_s22 = int_to_ptr.vmem [resolvable:$false] %s1680_s22 }
  0x5b   : > { %v368_v20 = vsel %vm365_vm1, %v366_v17, %v367_v18  ;;  %1444 = vmatpush3.bf16.msra.mxu0 %v1441_v12  ;;  %v370_v28 = vsel %vm365_vm1, %v367_v18, %v369_v24  ;;  %v1487_v61 = vpack.c.bf16 %v784_v58, %v782_v56  ;;  %v1489_v62 = vpack.c.bf16 %v789_v60, %v787_v59  ;;  %v788_v0 = vld [vmem:[#allocation5 + $0xb0] sm:$0xff]  ;;  %v1305_v2 = vld [vmem:[%s2109_s2] ss:$0 sm:$0xff]  ;;  %v649_v17 = vld [vmem:[%s2111_s4 + $0x8] sm:$0xff]  ;;  %s1682_s24 = scalar_lea.vmem %s1681_s22, 2048  ;;  %p1683_p4 = scmp.lt.s32.totalorder %s2055_s18, %s1681_s22 }
  0x5c   : > { %1382 = vmatprep.mubr.msk.f32.mxu0 %vm371_vm2, %v368_v20  ;;  %1446 = vmatprep.subr.bf16.mxu0 %v1445_v19  ;;  %v542_v44 = vsel %vm539_vm3, %v540_v39, %v541_v40  ;;  %v544_v52 = vsel %vm539_vm3, %v541_v40, %v543_v51  ;;  %v1491_v1 = vpack.c.bf16 %v788_v0, %v786_v63  ;;  %v1306_v4 = vld [vmem:[%s2110_s3] ss:$0 sm:$0xff]  ;;  %v650_v18 = vld [vmem:[%s2111_s4 + $0x10] sm:$0xff]  ;;  %v795_v24 = vld [vmem:[#allocation5 + $0xe8] sm:$0xff]  ;;  %p1679_p3 = pneg %p1678_p2  ;;  %p1684_p7 = scmp.lt.s32.totalorder %s1682_s24, %s1676_s9 }
  0x5d   : > { %1486 = vmatprep.subr.bf16.mxu1 %v1485_v57  ;;  %v790_v21 = vld [vmem:[#allocation5 + $0xc0] sm:$0xff]  ;;  %v792_v22 = vld [vmem:[#allocation5 + $0xd0] sm:$0xff]  ;;  %v766_v30 = vld [vmem:[#allocation5 + $0x8] sm:$0xff] }
  0x5e   : > { %1488 = vmatpush1.bf16.msra.mxu1 %v1487_v61  ;;  %v1495_v23 = vpack.c.bf16 %v792_v22, %v790_v21  ;;  %v794_v27 = vld [vmem:[#allocation5 + $0xe0] sm:$0xff]  ;;  %v768_v31 = vld [vmem:[#allocation5 + $0x18] sm:$0xff]  ;;  %v770_v40 = vld [vmem:[#allocation5 + $0x28] sm:$0xff]  ;;  %p1685_p8 = por %p1684_p7, %p1683_p4 }
  0x5f   : > { %1448 = vmatpush3.bf16.msra.mxu0 %v1445_v19  ;;  %1490 = vmatprep.subr.bf16.mxu1 %v1489_v62  ;;  %v793_v19 = vld [vmem:[#allocation5 + $0xd8] sm:$0xff]  ;;  %v765_v37 = vld [vmem:[#allocation5] sm:$0xff]  ;;  %v774_v57 = vld [vmem:[#allocation5 + $0x48] sm:$0xff] }
  0x60   : > { %1450 = vmatprep.subr.bf16.mxu0 %v1449_v25  ;;  %v772_v41 = vld [vmem:[#allocation5 + $0x38] sm:$0xff]  ;;  %v769_v46 = vld [vmem:[#allocation5 + $0x20] sm:$0xff]  ;;  %v1005_v21 = vld [vmem:[#allocation5 + $0x108] sm:$0xff]  ;;  %p1686_p11 = pnand %p1685_p8, %p1679_p3 }
  0x61   : > { %v1505_v55 = vpack.c.bf16 %v772_v41, %v770_v40  ;;  %v776_v58 = vld [vmem:[#allocation5 + $0x58] sm:$0xff]  ;;  %v1017_v40 = vld [vmem:[#allocation5 + $0x168] sm:$0xff] }
  0x62   : > { %1383 = vmatmul.mubr.msk.f32.vlgmr.msra.gmra.mrb[0].mxu0 %vm371_vm2, %v370_v28  ;;  %1492 = vmatpush1.bf16.msra.mxu1 %v1491_v1  ;;  %v796_v28 = vld [vmem:[#allocation5 + $0xf0] sm:$0xff]  ;;  %v1007_v22 = vld [vmem:[#allocation5 + $0x118] sm:$0xff] }
  0x63   : > { %1452 = vmatpush3.bf16.msra.mxu0 %v1449_v25  ;;  %1401 = vmatprep.mubr.msk.f32.mxu0 %vm371_vm2, %v344_v13  ;;  %v797_v25 = vld [vmem:[#allocation5 + $0xf8] sm:$0xff] }
  0x64   : > { %1454 = vmatprep.subr.bf16.mxu0 %v1453_v29  ;;  %v1497_v26 = vpack.c.bf16 %v797_v25, %v795_v24  ;;  %v1517_v24 = vpack.c.bf16 %v1007_v22, %v1005_v21  ;;  %v1004_v25 = vld [vmem:[#allocation5 + $0x100] sm:$0xff]  ;;  %v1019_v41 = vld [vmem:[#allocation5 + $0x178] sm:$0xff] }
  0x67   : > { %1456 = vmatpush3.bf16.msra.mxu0 %v1453_v29  ;;  %v1499_v29 = vpack.c.bf16 %v796_v28, %v794_v27  ;;  %v1009_v27 = vld [vmem:[#allocation5 + $0x128] sm:$0xff]  ;;  %v1011_v28 = vld [vmem:[#allocation5 + $0x138] sm:$0xff] }
  0x68   : > { %1458 = vmatprep.subr.bf16.mxu0 %v1457_v32 }
  0x6b   : > { %1460 = vmatpush3.bf16.msra.mxu0 %v1457_v32  ;;  %v1501_v32 = vpack.c.bf16 %v768_v31, %v766_v30  ;;  %v1521_v30 = vpack.c.bf16 %v1011_v28, %v1009_v27  ;;  %v1008_v31 = vld [vmem:[#allocation5 + $0x120] sm:$0xff] }
  0x6c   : > { %1462 = vmatprep.subr.bf16.mxu0 %v1461_v35 }
  0x6f   : > { %1464 = vmatpush3.bf16.msra.mxu0 %v1461_v35 }
  0x70   : > { %1466 = vmatprep.subr.bf16.mxu0 %v1465_v38 }
  0x72   : > { %1402 = vmatmul.mubr.msk.f32.vlgmr.msra.gmra.mrb[0].mxu0 %vm371_vm2, %v1936_v16 }
  0x73   : > { %1468 = vmatpush3.bf16.msra.mxu0 %v1465_v38  ;;  %1420 = vmatprep.mubr.msk.f32.mxu0 %vm371_vm2, %v542_v44  ;;  %v767_v38 = vld [vmem:[#allocation5 + $0x10] sm:$0xff] }
  0x74   : > { %1470 = vmatprep.subr.bf16.mxu0 %v1469_v43  ;;  %v1503_v45 = vpack.c.bf16 %v767_v38, %v765_v37  ;;  %v1012_v38 = vld [vmem:[#allocation5 + $0x140] sm:$0xff] }
  0x77   : > { %1472 = vmatpush3.bf16.msra.mxu0 %v1469_v43 }
  0x78   : > { %1474 = vmatprep.subr.bf16.mxu0 %v1473_v47 }
  0x7b   : > { %1476 = vmatpush3.bf16.msra.mxu0 %v1473_v47 }
  0x7c   : > { %1478 = vmatprep.subr.bf16.mxu0 %v1477_v50 }
  0x7f   : > { %1480 = vmatpush3.bf16.msra.mxu0 %v1477_v50 }
  0x82   : > { %1421 = vmatmul.mubr.msk.f32.vlgmr.msra.gmra.mrb[0].mxu0 %vm371_vm2, %v544_v52  ;;  %v771_v52 = vld [vmem:[#allocation5 + $0x30] sm:$0xff] }
  0x83   : > { %1427 = vmatprep.mubr.msk.f32.mxu0 %vm652_vm4, %v648_v53  ;;  %v1507_v63 = vpack.c.bf16 %v771_v52, %v769_v46  ;;  %v1018_v46 = vld [vmem:[#allocation5 + $0x170] sm:$0xff]  ;;  %v1154_v52 = vld [vmem:[%s2114_s7] sm:$0x3] }
 0x155   : > { %v1422_v3 = vpop.f32.mrb[0].mxu0 }
 0x156   : > { %v634_v5 = vmul.f32 %v1422_v3, %v1305_v2  ;;  %v615_v6 = vpop.f32.mrb[1].mxu0 }
 0x157   : > { %v633_v7 = vmul.f32 %v1305_v2, %v615_v6  ;;  %v1509_v6 = vpack.c.bf16 %v776_v58, %v774_v57 }
 0x158   : > { %v643_v10 = vadd.f32 %v1306_v4, %v634_v5 }
 0x159   : > { %v642_v11 = vadd.f32 %v1306_v4, %v633_v7  ;;  %v773_v7 = vld [vmem:[#allocation5 + $0x40] sm:$0xff] }
 0x15a   : > { %v645_v12 = vmax.f32 %v643_v10, 0.0  ;;  %v775_v10 = vld [vmem:[#allocation5 + $0x50] sm:$0xff] }
 0x15b   : > { %v644_v13 = vmax.f32 %v642_v11, 0.0 }
 0x15c   : > { %v647_v14 = vadd.f32 %v645_v12, %v1930_v9  ;;  %v651_v9 = vld [vmem:[%s2111_s4 + $0x18] sm:$0xff] }
 0x15d   : > { %v646_v15 = vadd.f32 %v644_v13, %v1928_v8  ;;  %v791_v8 = vld [vmem:[#allocation5 + $0xc8] sm:$0xff] }
 0x15e   : > { %v1493_v20 = vpack.c.bf16 %v793_v19, %v791_v8  ;;  %v777_v19 = vld [vmem:[#allocation5 + $0x60] sm:$0xff] }
 0x15f   : > { %v1481_v16 = vpack.c.bf16 %v647_v14, %v646_v15  ;;  %v778_v14 = vld [vmem:[#allocation5 + $0x68] sm:$0xff]  ;;  %v780_v15 = vld [vmem:[#allocation5 + $0x78] sm:$0xff] }
 0x160   : > { %1494 = vmatprep.subr.bf16.mxu1 %v1493_v20  ;;  %v1513_v8 = vpack.c.bf16 %v780_v15, %v778_v14  ;;  %v779_v20 = vld [vmem:[#allocation5 + $0x70] sm:$0xff] }
 0x161   : > { %1482 = vmatprep.subr.bf16.mxu0 %v1481_v16  ;;  %1496 = vmatpush1.bf16.msra.mxu1 %v1495_v23  ;;  %v1515_v23 = vpack.c.bf16 %v779_v20, %v777_v19 }
 0x162   : > { %1484 = vmatpush3.bf16.msra.mxu0 %v1481_v16  ;;  %1498 = vmatprep.subr.bf16.mxu1 %v1497_v26  ;;  %v1006_v26 = vld [vmem:[#allocation5 + $0x110] sm:$0xff] }
 0x165   : > { %1428 = vmatmul.mubr.msk.f32.vlgmr.msra.gmra.mrb[2].mxu0 %vm652_vm4, %v649_v17  ;;  %1500 = vmatpush1.bf16.msra.mxu1 %v1499_v29  ;;  %v1519_v29 = vpack.c.bf16 %v1006_v26, %v1004_v25 }
 0x166   : > { %1430 = vmatprep.mubr.msk.f32.mxu0 %vm652_vm4, %v650_v18  ;;  %1502 = vmatprep.subr.bf16.mxu1 %v1501_v32  ;;  %v1010_v32 = vld [vmem:[#allocation5 + $0x130] sm:$0xff] }
 0x169   : > { %1431 = vmatmul.mubr.msk.f32.gmra.mrb[4].mxu0 %vm652_vm4, %v651_v9  ;;  %v1511_v9 = vpack.c.bf16 %v775_v10, %v773_v7 }
 0x238   : > { %v1429_v34 = vpop.f32.mrb[2].mxu0 }
 0x239   : > { %v755_v35 = vrot.slane %v1429_v34, 7  ;;  %v731_v36 = vpop.f32.mrb[3].mxu0  ;;  %v1013_v34 = vld [vmem:[#allocation5 + $0x148] sm:$0xff] }
 0x23a   : > { %v754_v39 = vrot.slane %v731_v36, 7  ;;  %v1523_v36 = vpack.c.bf16 %v1010_v32, %v1008_v31 }
 0x23c   : > { %v1978_v42 = vsel %vm338_vm0, %v754_v39, %v755_v35  ;;  %v1981_v43 = vsel %vm338_vm0, 0.0, %v754_v39  ;;  %v1432_v44 = vpop.f32.mrb[4].mxu0  ;;  %v1014_v39 = vld [vmem:[#allocation5 + $0x150] sm:$0xff] }
 0x23d   : > { %v800_v47 = vrot.slane %v1981_v43, 1  ;;  %v801_v48 = vrot.slane %v1978_v42, 1  ;;  %v1020_v49 = vrot.slane %v1981_v43, 2  ;;  %v1021_v50 = vrot.slane %v1978_v42, 2  ;;  %v741_v51 = vpop.f32.mrb[5].mxu0 }
 0x23e   : > { %v759_v53 = vrot.slane %v1432_v44, 7  ;;  %v757_v54 = vrot.slane %v741_v51, 7  ;;  %v1527_v44 = vpack.c.bf16 %v1014_v39, %v1012_v38 }
 0x23f   : > { %v802_v56 = vsel %vm365_vm1, %v800_v47, %v801_v48  ;;  %v1989_v59 = vsel %vm539_vm3, %v1020_v49, %v1021_v50 }
 0x240   : > { %v764_v60 = vsel %vm338_vm0, %v759_v53, 0.0  ;;  %v1993_v61 = vsel %vm338_vm0, %v755_v35, %v757_v54  ;;  %v1996_v62 = vsel %vm338_vm0, %v757_v54, %v759_v53  ;;  %1311 = vmatmul.mubr.msk.f32.vlgmr.msra.gmra.mrb[0].mxu1 %vm371_vm2, %v802_v56  ;;  %v1015_v35 = vld [vmem:[#allocation5 + $0x158] sm:$0xff] }
 0x241   : > { %v807_v0 = vrot.slane %v764_v60, 1  ;;  %v1027_v1 = vrot.slane %v764_v60, 2  ;;  %v803_v2 = vrot.slane %v1993_v61, 1  ;;  %v805_v3 = vrot.slane %v1996_v62, 1  ;;  %1504 = vmatpush1.bf16.msra.mxu1 %v1503_v45  ;;  %887 = vmatprep.mubr.f32.mxu1 %v1754_v33 }
 0x242   : > { %v1023_v4 = vrot.slane %v1993_v61, 2  ;;  %v1025_v5 = vrot.slane %v1996_v62, 2  ;;  %1506 = vmatprep.subr.bf16.mxu1 %v1505_v55  ;;  %v1525_v37 = vpack.c.bf16 %v1015_v35, %v1013_v34  ;;  %v1529_v45 = vpack.c.bf16 %v1019_v41, %v1017_v40 }
 0x243   : > { %v804_v11 = vsel %vm365_vm1, %v801_v48, %v803_v2  ;;  %v806_v12 = vsel %vm365_vm1, %v803_v2, %v805_v3  ;;  %v808_v13 = vsel %vm365_vm1, %v805_v3, %v807_v0 }
 0x244   : > { %1312 = vmatmul.mubr.msk.f32.gmra.mrb[2].mxu1 %vm371_vm2, %v804_v11  ;;  %v1024_v16 = vsel %vm539_vm3, %v1021_v50, %v1023_v4  ;;  %v1026_v17 = vsel %vm539_vm3, %v1023_v4, %v1025_v5  ;;  %v1028_v18 = vsel %vm539_vm3, %v1025_v5, %v1027_v1  ;;  %v1134_v50 = vld [vmem:[%s2113_s6] sm:$0x3] }
 0x245   : > { %1508 = vmatpush1.bf16.msra.mxu1 %v1507_v63  ;;  %893 = vmatprep.mubr.f32.mxu1 %v1754_v33 }
 0x246   : > { %1510 = vmatprep.subr.bf16.mxu1 %v1509_v6 }
 0x248   : > { %1313 = vmatmul.mubr.msk.f32.gmra.mrb[4].mxu1 %vm371_vm2, %v806_v12 }
 0x249   : > { %1512 = vmatpush1.bf16.msra.mxu1 %v1511_v9  ;;  %899 = vmatprep.mubr.f32.mxu1 %v1754_v33 }
 0x24a   : > { %1514 = vmatprep.subr.bf16.mxu1 %v1513_v8 }
 0x24c   : > { %1314 = vmatmul.mubr.msk.f32.gmra.mrb[6].mxu1 %vm371_vm2, %v808_v13 }
 0x24d   : > { %1516 = vmatpush1.bf16.msra.mxu1 %v1515_v23  ;;  %978 = vmatprep.mubr.f32.mxu1 %v1754_v33 }
 0x24e   : > { %1518 = vmatprep.subr.bf16.mxu1 %v1517_v24 }
 0x250   : > { %1315 = vmatmul.mubr.msk.f32.vlgmr.msra.gmra.mrb[0].mxu1 %vm371_vm2, %v1981_v43  ;;  %v1016_v43 = vld [vmem:[#allocation5 + $0x160] sm:$0xff] }
 0x251   : > { %1520 = vmatpush1.bf16.msra.mxu1 %v1519_v29  ;;  %984 = vmatprep.mubr.f32.mxu1 %v1754_v33  ;;  %v1531_v47 = vpack.c.bf16 %v1018_v46, %v1016_v43 }
 0x252   : > { %1522 = vmatprep.subr.bf16.mxu1 %v1521_v30 }
 0x254   : > { %1316 = vmatmul.mubr.msk.f32.gmra.mrb[2].mxu1 %vm371_vm2, %v1978_v42  ;;  %v1136_v42 = vlaneseq }
 0x255   : > { %1524 = vmatpush1.bf16.msra.mxu1 %v1523_v36  ;;  %990 = vmatprep.mubr.f32.mxu1 %v1754_v33 }
 0x256   : > { %1526 = vmatprep.subr.bf16.mxu1 %v1525_v37  ;;  %v1137_v48 = vshrl.u32 %v1136_v42, 7 }
 0x258   : > { %1317 = vmatmul.mubr.msk.f32.gmra.mrb[4].mxu1 %vm371_vm2, %v1993_v61  ;;  %v1138_v49 = vsub.s32 0, %v1137_v48  ;;  %v1142_v51 = vsub.s32 1, %v1137_v48 }
 0x259   : > { %1528 = vmatpush1.bf16.msra.mxu1 %v1527_v44  ;;  %996 = vmatprep.mubr.f32.mxu1 %v1754_v33 }
 0x25a   : > { %1530 = vmatprep.subr.bf16.mxu1 %v1529_v45  ;;  %v1139_v53 = vrot.slane %v1134_v50, %v1138_v49  ;;  %v1143_v54 = vrot.slane %v1134_v50, %v1142_v51  ;;  %v1159_v55 = vrot.slane %v1154_v52, %v1138_v49 }
 0x25c   : > { %1318 = vmatmul.mubr.msk.f32.gmra.mrb[6].mxu1 %vm371_vm2, %v1996_v62 }
 0x25d   : > { %1532 = vmatpush1.bf16.msra.mxu1 %v1531_v47  ;;  %1101 = vmatprep.mubr.f32.mxu1 %v1754_v33 }
 0x260   : > { %1319 = vmatmul.mubr.msk.f32.vlgmr.msra.gmra.mrb[0].mxu1 %vm371_vm2, %v1989_v59 }
 0x261   : > { %1107 = vmatprep.mubr.f32.mxu1 %v1754_v33 }
 0x264   : > { %1320 = vmatmul.mubr.msk.f32.gmra.mrb[2].mxu1 %vm371_vm2, %v1024_v16 }
 0x265   : > { %1113 = vmatprep.mubr.f32.mxu1 %v1754_v33 }
 0x268   : > { %1321 = vmatmul.mubr.msk.f32.gmra.mrb[4].mxu1 %vm371_vm2, %v1026_v17 }
 0x269   : > { %1119 = vmatprep.mubr.f32.mxu1 %v1754_v33  ;;  %v1163_v33 = vrot.slane %v1154_v52, %v1142_v51 }
 0x26c   : > { %1322 = vmatmul.mubr.msk.f32.gmra.mrb[6].mxu1 %vm371_vm2, %v1028_v18 }
 0x333   : > { %v1103_v56 = vpop.f32.mrb[0].mxu1 }
 0x334   : > { %v1146_v57 = vmul.f32 %v1139_v53, %v1103_v56  ;;  %v1105_v58 = vpop.f32.mrb[1].mxu1 }
 0x335   : > { %v1147_v59 = vmul.f32 %v1143_v54, %v1105_v58 }
 0x336   : > { %v1166_v60 = vadd.f32 %v1159_v55, %v1146_v57 }
 0x337   : > { %v1167_v61 = vadd.f32 %v1163_v33, %v1147_v59  ;;  %v1109_v62 = vpop.f32.mrb[2].mxu1 }
 0x338   : > { %v1174_v63 = vmax.f32 %v1166_v60, 0.0  ;;  %v1148_v0 = vmul.f32 %v1139_v53, %v1109_v62  ;;  %v1111_v1 = vpop.f32.mrb[3].mxu1 }
 0x339   : > { %v1175_v2 = vmax.f32 %v1167_v61, 0.0  ;;  %v1149_v3 = vmul.f32 %v1143_v54, %v1111_v1 }
 0x33a   : > { %1182 = vst [vmem:[%s2045_s13] sm:$0xff] %v1174_v63  ;;  %v1168_v4 = vadd.f32 %v1159_v55, %v1148_v0 }
 0x33b   : > { %1183 = vst [vmem:[%s2045_s13 + $0x8] sm:$0xff] %v1175_v2  ;;  %v1169_v5 = vadd.f32 %v1163_v33, %v1149_v3  ;;  %v1115_v6 = vpop.f32.mrb[4].mxu1 }
 0x33c   : > { %v1176_v7 = vmax.f32 %v1168_v4, 0.0  ;;  %v1150_v10 = vmul.f32 %v1139_v53, %v1115_v6  ;;  %v1117_v11 = vpop.f32.mrb[5].mxu1 }
 0x33d   : > { %v1177_v12 = vmax.f32 %v1169_v5, 0.0  ;;  %v1151_v13 = vmul.f32 %v1143_v54, %v1117_v11 }
 0x33e   : > { %1184 = vst [vmem:[%s2045_s13 + $0x10] sm:$0xff] %v1176_v7  ;;  %v1170_v14 = vadd.f32 %v1159_v55, %v1150_v10 }
 0x33f   : > { %1185 = vst [vmem:[%s2045_s13 + $0x18] sm:$0xff] %v1177_v12  ;;  %v1171_v15 = vadd.f32 %v1163_v33, %v1151_v13  ;;  %v1121_v16 = vpop.f32.mrb[6].mxu1 }
 0x340   : > { %v1178_v17 = vmax.f32 %v1170_v14, 0.0  ;;  %v1152_v18 = vmul.f32 %v1139_v53, %v1121_v16  ;;  %v1123_v9 = vpop.f32.mrb[7].mxu1 }
 0x341   : > { %v1179_v8 = vmax.f32 %v1171_v15, 0.0  ;;  %v1153_v19 = vmul.f32 %v1143_v54, %v1123_v9 }
 0x342   : > { %1186 = vst [vmem:[%s2045_s13 + $0x20] sm:$0xff] %v1178_v17  ;;  %v1172_v20 = vadd.f32 %v1159_v55, %v1152_v18 }
 0x343   : > { %1187 = vst [vmem:[%s2045_s13 + $0x28] sm:$0xff] %v1179_v8  ;;  %v1173_v21 = vadd.f32 %v1163_v33, %v1153_v19 }
 0x344   : > { %v1180_v22 = vmax.f32 %v1172_v20, 0.0 }
 0x345   : > { %v1181_v23 = vmax.f32 %v1173_v21, 0.0 }
 0x346   : > { %1188 = vst [vmem:[%s2045_s13 + $0x30] sm:$0xff] %v1180_v22 }
 0x347   : > { %1189 = vst [vmem:[%s2045_s13 + $0x38] sm:$0xff] %v1181_v23 }
 0x348   : > { %1689 = shalt.err (!%p1686_p11)
}
 0x349   : > { %s1690_s17 = scalar_lea.hbm %s2060_s21, 1024  ;;  %s1694_s10 = scalar_lea.hbm %s2115_s8, 2048 }
 0x34a   : > { %p1691_p13 = scmp.ne.s32.totalorder %s2060_s21, %s1690_s17  ;;  %p1695_p6 = scmp.lt.u32.totalorder %s2060_s21, %s2115_s8 }
 0x34b   : > { %p1696_p9 = scmp.lt.u32.totalorder %s1694_s10, %s1690_s17  ;;  %p1698_p12 = scmp.lt.u32.totalorder %s1690_s17, %s2060_s21 }
 0x34c   : > { %p1692_p0 = pnand %p1691_p13, %p2131_p1 }
 0x34d   : > { %p1697_p10 = por %p1696_p9, %p1695_p6 }
 0x34e   : > { %p1693_p5 = pneg %p1692_p0 }
 0x34f   : > { %p1699_p2 = por %p1698_p12, %p1697_p10 }
 0x351   : > { %p1700_p3 = pnand %p1699_p2, %p1693_p5 }
 0x353   : > { %1703 = shalt.err (!%p1700_p3)
}
 0x354   : > { %s1756_s19 = smov 256   ;;  %s1757_s29 = smov 16  }
 0x355   : > { %1561 = dma.vmem_to_hbm [thread:$0]  (%p2131_p1), %s2055_s18, 1024, %s2060_s21, %s2066_s23, %s1756_s19, %s1756_s19, %s1757_s29  }
 0x356 PF: > { %p1578_p4 = scmp.ge.s32.totalorder %s1746_s30, 2  ;;  %s1219_s14 = sand.u32 1, %s1734_s27  }
 0x357   : > { %p2132_p7 = scmp.ne.s32.totalorder %s2123_s16, 0  ;;  %s1220_s9 = scalar_lea.sflag [#allocation4], %s1219_s14 }
 0x359   : > { %p1571_p8 = pnand %p1578_p4, %p2132_p7 }
 0x35b   : > { %1729 = dma.done.wait (!%p1571_p8), %s1220_s9, 1024  }
 0x35c   : > { %1731 = vsyncadd (!%p1571_p8), %s1220_s9, 4294966272  ;;  %s2133_s20 = sld [smem:[#allocation11_spill]]  ;;  %s2134_s29 = sld [smem:[#allocation12_spill]] }
 0x35d   : > { %p20_p11 = scmp.ge.s32.totalorder %s1828_s11, 4   ;;  %s2135_s27 = smov %s1738_s28 }
 0x35e   : > { %s2137_s30 = smov %s1828_s11 }
 0x35f   :  { %22 = sbr.rel (!%p20_p11) target bundleno = 5 (0x5), region = 100 }
 0x362   : > { %s2136_s28 = smov %s2133_s20 }
 0x366   :  { %1225 = vsyncpa [#allocation3], 1 }
 0x367   :  { %1227 = vsyncpa [#allocation3 + $0x1], 1 }
 0x368   :  { %1228 = vsyncpa [#allocation6], 1 }
 0x369   :  { %1229 = vsyncpa [#allocation4], 1 }
 0x36a   :  { %1231 = vsyncpa [#allocation4 + $0x1], 1 }

</bundles_post_ra>
